<compile_context>
chip_gen: v7x
topology: tpu7x:2x2x1
jax: 0.10.0
libtpu: 0.0.40
codegen_flags: <defaults>
</compile_context>

<pallas_src>
import math

import jax
import jax.numpy as jnp
from jax import lax
from jax.experimental import pallas as pl
from jax.experimental.pallas import tpu as pltpu

PR_SHAPE = 16
SBOX_SHAPE = 16
IN_F = PR_SHAPE + SBOX_SHAPE      # 32
HIDDEN = 250
HP = 256                          # hidden padded to lane-friendly 256
N_CLASSES = 9
NCP = 16                          # 9 padded to 16

# Row offsets of each weight inside the packed bf16 slab.
# All offsets / heights are multiples of 16 (bf16 sublane tile), lane width 256.
R_PR_W1 = 0        # (32, 256)  x-split folded: rows 0:16 hold pr_fc1
R_SR_W1 = 32       # (32, 256)  rows 16:32 hold sbox_r_fc1
R_PR_W2 = 64       # (256, 256) pr_fc2
R_SR_W2 = 320      # (256, 256) sbox_r_fc2
R_SB_W2 = 576      # (256, 256) sbox_fc2
R_SB_W1A = 832     # (16, 256)  sbox_fc1 rows for the pr half of the concat
R_SB_W1B = 848     # (16, 256)  sbox_fc1 rows for the sbox_r half
R_PR_WE_T = 864    # (16, 256)  pr_fc_end, stored TRANSPOSED
R_SR_WE_T = 880    # (16, 256)  sbox_r_end, stored TRANSPOSED
R_SB_WE_T = 896    # (16, 256)  sbox_fc_end, stored TRANSPOSED
W_ROWS = 912

# Bias slab rows (f32, lane width 256; 9 rows used, padded to 16)
BROW_PR_B1, BROW_SR_B1 = 0, 1
BROW_PR_B2, BROW_SR_B2 = 2, 3
BROW_PR_BE, BROW_SR_BE = 4, 5
BROW_SB_B1, BROW_SB_B2, BROW_SB_BE = 6, 7, 8
B_ROWS = 16

BATCH = 16


# ---------------------------------------------------------------------------
# Kernel
# ---------------------------------------------------------------------------
def testnet_kernel(x_ref, w_ref, b_ref, out_ref):
    # Hoist the x -> bf16 cast once; activations stay bf16 right after ReLU.
    xb = x_ref[...].astype(jnp.bfloat16)          # (TB, 32)
    bias = b_ref[...]                             # (16, 256) f32, one load

    def mm(a, w):
        # standard NN matmul: bf16 x bf16 on the MXU, f32 accumulate
        return jnp.dot(a, w, preferred_element_type=jnp.float32)

    def mm_t(a, wt):
        # weight stored transposed (rows = out, cols = in): contract last dims
        return lax.dot_general(a, wt, (((1,), (1,)), ((), ())),
                               preferred_element_type=jnp.float32)

    def relu_bf16(y):
        return jnp.maximum(y, 0.0).astype(jnp.bfloat16)

    # first layers (x split folded into zero-padded weight rows)
    pr = relu_bf16(mm(xb, w_ref[R_PR_W1:R_PR_W1 + 32, :]) + bias[BROW_PR_B1:BROW_PR_B1 + 1, :])
    sr = relu_bf16(mm(xb, w_ref[R_SR_W1:R_SR_W1 + 32, :]) + bias[BROW_SR_B1:BROW_SR_B1 + 1, :])
    # hidden layers
    pr = relu_bf16(mm(pr, w_ref[R_PR_W2:R_PR_W2 + HP, :]) + bias[BROW_PR_B2:BROW_PR_B2 + 1, :])
    sr = relu_bf16(mm(sr, w_ref[R_SR_W2:R_SR_W2 + HP, :]) + bias[BROW_SR_B2:BROW_SR_B2 + 1, :])
    # branch end layers (relu'd, per the module); weights stored transposed
    pr_e = relu_bf16(mm_t(pr, w_ref[R_PR_WE_T:R_PR_WE_T + NCP, :])
                     + bias[BROW_PR_BE:BROW_PR_BE + 1, :NCP])
    sr_e = relu_bf16(mm_t(sr, w_ref[R_SR_WE_T:R_SR_WE_T + NCP, :])
                     + bias[BROW_SR_BE:BROW_SR_BE + 1, :NCP])
    # concat(pr_e, sr_e) @ sbox_fc1 expressed as split-weight sum (exact:
    # padded lanes of pr_e / sr_e are zero)
    h = relu_bf16(mm(pr_e, w_ref[R_SB_W1A:R_SB_W1A + NCP, :])
                  + mm(sr_e, w_ref[R_SB_W1B:R_SB_W1B + NCP, :])
                  + bias[BROW_SB_B1:BROW_SB_B1 + 1, :])
    h = relu_bf16(mm(h, w_ref[R_SB_W2:R_SB_W2 + HP, :]) + bias[BROW_SB_B2:BROW_SB_B2 + 1, :])
    # final layer: no relu
    out = mm_t(h, w_ref[R_SB_WE_T:R_SB_WE_T + NCP, :]) + bias[BROW_SB_BE:BROW_SB_BE + 1, :NCP]
    out_ref[...] = out.astype(out_ref.dtype)


# ---------------------------------------------------------------------------
# Wrapper
# ---------------------------------------------------------------------------
def _round_up(n, m):
    return ((n + m - 1) // m) * m


def testnet_forward(x, pp):
    Bsz, F = x.shape
    assert F == IN_F
    W, Bv = pp["W"], pp["B"]

    # batch tiling: weights/biases use constant index_maps so they are DMA'd
    # once and stay VMEM-resident across all batch tiles.
    TB = min(128, _round_up(Bsz, 8))
    B_pad = _round_up(Bsz, TB)
    if B_pad != Bsz:
        x = jnp.pad(x, ((0, B_pad - Bsz), (0, 0)))
    nb = B_pad // TB

    flops_per_row = 2 * (2 * IN_F * HP + 3 * HP * HP + 3 * HP * NCP + 2 * NCP * HP)
    bytes_accessed = int(W.size * W.dtype.itemsize + Bv.size * Bv.dtype.itemsize
                         + x.size * x.dtype.itemsize + B_pad * NCP * 4)
    cost = pl.CostEstimate(flops=int(B_pad * flops_per_row), transcendentals=0,
                           bytes_accessed=bytes_accessed)

    out = pl.pallas_call(
        testnet_kernel,
        out_shape=jax.ShapeDtypeStruct((B_pad, NCP), jnp.float32),
        grid_spec=pltpu.PrefetchScalarGridSpec(
            num_scalar_prefetch=0,
            grid=(nb,),
            in_specs=[
                pl.BlockSpec((TB, IN_F), lambda i: (i, 0)),       # batch tile of x
                pl.BlockSpec((W_ROWS, HP), lambda i: (0, 0)),     # packed weights, resident
                pl.BlockSpec((B_ROWS, HP), lambda i: (0, 0)),     # packed biases, resident
            ],
            out_specs=pl.BlockSpec((TB, NCP), lambda i: (i, 0)),
        ),
        compiler_params=pltpu.CompilerParams(
            # single-TensorCore sequential batch loop; weight DMA never duplicated
            dimension_semantics=("arbitrary",)),
        cost_estimate=cost,
    )(x, W, Bv)

    return out[:Bsz, :N_CLASSES]


# ---------------------------------------------------------------------------
# Parameter construction (logical shapes match the PyTorch module, then packed)
# ---------------------------------------------------------------------------
def xavier_uniform(key, fan_in, fan_out):
    # weight already transposed to [in, out]
    bound = math.sqrt(6.0 / (fan_in + fan_out))
    return jax.random.uniform(key, (fan_in, fan_out), jnp.float32, -bound, bound)


def bias_uniform(key, fan_in, fan_out):
    # torch.nn.Linear default bias init: U(-1/sqrt(fan_in), 1/sqrt(fan_in))
    bound = 1.0 / math.sqrt(fan_in)
    return jax.random.uniform(key, (fan_out,), jnp.float32, -bound, bound)


def init_raw_params(key):
    keys = jax.random.split(key, 18)
    p = {}
    p["pr_w1"] = xavier_uniform(keys[0], PR_SHAPE, HIDDEN)
    p["pr_b1"] = bias_uniform(keys[1], PR_SHAPE, HIDDEN)
    p["pr_w2"] = xavier_uniform(keys[2], HIDDEN, HIDDEN)
    p["pr_b2"] = bias_uniform(keys[3], HIDDEN, HIDDEN)
    p["pr_we"] = xavier_uniform(keys[4], HIDDEN, N_CLASSES)
    p["pr_be"] = bias_uniform(keys[5], HIDDEN, N_CLASSES)
    p["sr_w1"] = xavier_uniform(keys[6], SBOX_SHAPE, HIDDEN)
    p["sr_b1"] = bias_uniform(keys[7], SBOX_SHAPE, HIDDEN)
    p["sr_w2"] = xavier_uniform(keys[8], HIDDEN, HIDDEN)
    p["sr_b2"] = bias_uniform(keys[9], HIDDEN, HIDDEN)
    p["sr_we"] = xavier_uniform(keys[10], HIDDEN, N_CLASSES)
    p["sr_be"] = bias_uniform(keys[11], HIDDEN, N_CLASSES)
    p["sb_w1"] = xavier_uniform(keys[12], 2 * N_CLASSES, HIDDEN)
    p["sb_b1"] = bias_uniform(keys[13], 2 * N_CLASSES, HIDDEN)
    p["sb_w2"] = xavier_uniform(keys[14], HIDDEN, HIDDEN)
    p["sb_b2"] = bias_uniform(keys[15], HIDDEN, HIDDEN)
    p["sb_we"] = xavier_uniform(keys[16], HIDDEN, N_CLASSES)
    p["sb_be"] = bias_uniform(keys[17], HIDDEN, N_CLASSES)
    return p


def prepare_params(rp):
    """Pack all weights into one bf16 slab (zero-padded, x-split folded into
    the first-layer rows, narrow end-layers stored transposed) and all biases
    into one f32 slab.  Weights bf16, biases f32."""
    # TODO(synk): optional int8 weight path for v5e/v6e (not portable to v7x).
    W = jnp.zeros((W_ROWS, HP), jnp.float32)
    W = W.at[R_PR_W1:R_PR_W1 + PR_SHAPE, :HIDDEN].set(rp["pr_w1"])
    W = W.at[R_SR_W1 + PR_SHAPE:R_SR_W1 + IN_F, :HIDDEN].set(rp["sr_w1"])
    W = W.at[R_PR_W2:R_PR_W2 + HIDDEN, :HIDDEN].set(rp["pr_w2"])
    W = W.at[R_SR_W2:R_SR_W2 + HIDDEN, :HIDDEN].set(rp["sr_w2"])
    W = W.at[R_SB_W2:R_SB_W2 + HIDDEN, :HIDDEN].set(rp["sb_w2"])
    W = W.at[R_SB_W1A:R_SB_W1A + N_CLASSES, :HIDDEN].set(rp["sb_w1"][:N_CLASSES])
    W = W.at[R_SB_W1B:R_SB_W1B + N_CLASSES, :HIDDEN].set(rp["sb_w1"][N_CLASSES:])
    W = W.at[R_PR_WE_T:R_PR_WE_T + N_CLASSES, :HIDDEN].set(rp["pr_we"].T)
    W = W.at[R_SR_WE_T:R_SR_WE_T + N_CLASSES, :HIDDEN].set(rp["sr_we"].T)
    W = W.at[R_SB_WE_T:R_SB_WE_T + N_CLASSES, :HIDDEN].set(rp["sb_we"].T)
    W = W.astype(jnp.bfloat16)

    Bv = jnp.zeros((B_ROWS, HP), jnp.float32)
    Bv = Bv.at[BROW_PR_B1, :HIDDEN].set(rp["pr_b1"])
    Bv = Bv.at[BROW_SR_B1, :HIDDEN].set(rp["sr_b1"])
    Bv = Bv.at[BROW_PR_B2, :HIDDEN].set(rp["pr_b2"])
    Bv = Bv.at[BROW_SR_B2, :HIDDEN].set(rp["sr_b2"])
    Bv = Bv.at[BROW_PR_BE, :N_CLASSES].set(rp["pr_be"])
    Bv = Bv.at[BROW_SR_BE, :N_CLASSES].set(rp["sr_be"])
    Bv = Bv.at[BROW_SB_B1, :HIDDEN].set(rp["sb_b1"])
    Bv = Bv.at[BROW_SB_B2, :HIDDEN].set(rp["sb_b2"])
    Bv = Bv.at[BROW_SB_BE, :N_CLASSES].set(rp["sb_be"])
    return {"W": W, "B": Bv}


# ---------------------------------------------------------------------------
# References
# ---------------------------------------------------------------------------
def testnet_ref_padded(x, pp):
    """Plain-JAX replica of the exact kernel math (same packed bf16 slabs)."""
    W, Bv = pp["W"], pp["B"]

    def mm(a, w):
        return jnp.dot(a, w, preferred_element_type=jnp.float32)

    def mm_t(a, wt):
        return lax.dot_general(a, wt, (((1,), (1,)), ((), ())),
                               preferred_element_type=jnp.float32)

    def relu_bf16(y):
        return jnp.maximum(y, 0.0).astype(jnp.bfloat16)

    xb = x.astype(jnp.bfloat16)
    pr = relu_bf16(mm(xb, W[R_PR_W1:R_PR_W1 + 32]) + Bv[BROW_PR_B1:BROW_PR_B1 + 1])
    sr = relu_bf16(mm(xb, W[R_SR_W1:R_SR_W1 + 32]) + Bv[BROW_SR_B1:BROW_SR_B1 + 1])
    pr = relu_bf16(mm(pr, W[R_PR_W2:R_PR_W2 + HP]) + Bv[BROW_PR_B2:BROW_PR_B2 + 1])
    sr = relu_bf16(mm(sr, W[R_SR_W2:R_SR_W2 + HP]) + Bv[BROW_SR_B2:BROW_SR_B2 + 1])
    pr_e = relu_bf16(mm_t(pr, W[R_PR_WE_T:R_PR_WE_T + NCP]) + Bv[BROW_PR_BE:BROW_PR_BE + 1, :NCP])
    sr_e = relu_bf16(mm_t(sr, W[R_SR_WE_T:R_SR_WE_T + NCP]) + Bv[BROW_SR_BE:BROW_SR_BE + 1, :NCP])
    h = relu_bf16(mm(pr_e, W[R_SB_W1A:R_SB_W1A + NCP])
                  + mm(sr_e, W[R_SB_W1B:R_SB_W1B + NCP])
                  + Bv[BROW_SB_B1:BROW_SB_B1 + 1])
    h = relu_bf16(mm(h, W[R_SB_W2:R_SB_W2 + HP]) + Bv[BROW_SB_B2:BROW_SB_B2 + 1])
    out = mm_t(h, W[R_SB_WE_T:R_SB_WE_T + NCP]) + Bv[BROW_SB_BE:BROW_SB_BE + 1, :NCP]
    return out[:, :N_CLASSES]


def testnet_ref_f32(x, rp):
    """Exact f32 reference of the original PyTorch forward."""
    relu = lambda v: jnp.maximum(v, 0.0)
    pr = x[:, :PR_SHAPE]
    sr = x[:, PR_SHAPE:PR_SHAPE + SBOX_SHAPE]
    pr = relu(pr @ rp["pr_w1"] + rp["pr_b1"])
    pr = relu(pr @ rp["pr_w2"] + rp["pr_b2"])
    pr = relu(pr @ rp["pr_we"] + rp["pr_be"])
    sr = relu(sr @ rp["sr_w1"] + rp["sr_b1"])
    sr = relu(sr @ rp["sr_w2"] + rp["sr_b2"])
    sr = relu(sr @ rp["sr_we"] + rp["sr_be"])
    cat = jnp.concatenate([pr, sr], axis=1)
    h = relu(cat @ rp["sb_w1"] + rp["sb_b1"])
    h = relu(h @ rp["sb_w2"] + rp["sb_b2"])
    return h @ rp["sb_we"] + rp["sb_be"]


if __name__ == "__main__":
    key = jax.random.PRNGKey(0)
    kx, kp = jax.random.split(key)
    x = jax.random.normal(kx, (BATCH, IN_F), jnp.float32)

    raw_params = init_raw_params(kp)
    packed_params = prepare_params(raw_params)

    out = testnet_forward(x, packed_params)
    jax.block_until_ready(out)
    assert out.shape == (BATCH, N_CLASSES)

    # Tight check vs. a plain-JAX replica using identical packed bf16 slabs.
    ref_b = testnet_ref_padded(x, packed_params)
    assert jnp.allclose(out, ref_b, atol=2e-3, rtol=2e-3), "mismatch vs packed-bf16 reference"

    # Loose check vs. the exact f32 module semantics (bf16 weight+activation
    # quantization is the only difference).
    ref_f = testnet_ref_f32(x, raw_params)
    assert jnp.allclose(out, ref_f, atol=1e-1, rtol=1e-1), "mismatch vs f32 reference"

    print("KERNEL_OK")
</pallas_src>

<mosaic_0001>
module attributes {stable_mosaic.version = 11 : i64} {
  func.func @testnet_kernel(%arg0: i32, %arg1: memref<16x32xf32, #tpu.memory_space<vmem>>, %arg2: memref<912x256xbf16, #tpu.memory_space<vmem>>, %arg3: memref<16x256xf32, #tpu.memory_space<vmem>>, %arg4: memref<16x16xf32, #tpu.memory_space<vmem>>) attributes {dimension_semantics = [#tpu.dimension_semantics<arbitrary>], iteration_bounds = array<i64: 1>, scalar_prefetch = 0 : i64, scratch_operands = 0 : i64, tpu.core_type = #tpu.core_type<tc>, window_params = [{transform_indices = @transform_0, window_bounds = array<i64: 16, 32>}, {pipeline_mode = #tpu.pipeline_mode<synchronous>, transform_indices = @transform_1, window_bounds = array<i64: 912, 256>}, {pipeline_mode = #tpu.pipeline_mode<synchronous>, transform_indices = @transform_2, window_bounds = array<i64: 16, 256>}, {transform_indices = @transform_3, window_bounds = array<i64: 16, 16>}]} {
    %c0 = arith.constant 0 : index
    %c0_0 = arith.constant 0 : index
    %0 = vector.load %arg1[%c0, %c0_0] : memref<16x32xf32, #tpu.memory_space<vmem>>, vector<16x32xf32>
    %1 = arith.truncf %0 : vector<16x32xf32> to vector<16x32xbf16>
    %c0_1 = arith.constant 0 : index
    %c0_2 = arith.constant 0 : index
    %2 = vector.load %arg3[%c0_1, %c0_2] : memref<16x256xf32, #tpu.memory_space<vmem>>, vector<16x256xf32>
    %c0_3 = arith.constant 0 : index
    %c0_4 = arith.constant 0 : index
    %3 = vector.load %arg2[%c0_3, %c0_4] : memref<912x256xbf16, #tpu.memory_space<vmem>>, vector<32x256xbf16>
    %cst = arith.constant dense<0.000000e+00> : vector<16x256xf32>
    %4 = tpu.matmul %1, %3, %cst {dimension_numbers = #tpu.dot_dimension_numbers<[1], [0], [0], [1], [0, 0, 1, 1], [], []>} : vector<16x32xbf16>, vector<32x256xbf16>, vector<16x256xf32> -> vector<16x256xf32>
    %5 = vector.extract_strided_slice %2 {offsets = [0, 0], sizes = [1, 256], strides = [1, 1]} : vector<16x256xf32> to vector<1x256xf32>
    %6 = vector.broadcast %5 : vector<1x256xf32> to vector<16x256xf32>
    %7 = arith.addf %4, %6 : vector<16x256xf32>
    %cst_5 = arith.constant 0.000000e+00 : f32
    %8 = vector.broadcast %cst_5 : f32 to vector<16x256xf32>
    %9 = arith.maximumf %7, %8 : vector<16x256xf32>
    %10 = arith.truncf %9 : vector<16x256xf32> to vector<16x256xbf16>
    %c32 = arith.constant 32 : index
    %c0_6 = arith.constant 0 : index
    %11 = vector.load %arg2[%c32, %c0_6] : memref<912x256xbf16, #tpu.memory_space<vmem>>, vector<32x256xbf16>
    %cst_7 = arith.constant dense<0.000000e+00> : vector<16x256xf32>
    %12 = tpu.matmul %1, %11, %cst_7 {dimension_numbers = #tpu.dot_dimension_numbers<[1], [0], [0], [1], [0, 0, 1, 1], [], []>} : vector<16x32xbf16>, vector<32x256xbf16>, vector<16x256xf32> -> vector<16x256xf32>
    %13 = vector.extract_strided_slice %2 {offsets = [1, 0], sizes = [1, 256], strides = [1, 1]} : vector<16x256xf32> to vector<1x256xf32>
    %14 = vector.broadcast %13 : vector<1x256xf32> to vector<16x256xf32>
    %15 = arith.addf %12, %14 : vector<16x256xf32>
    %cst_8 = arith.constant 0.000000e+00 : f32
    %16 = vector.broadcast %cst_8 : f32 to vector<16x256xf32>
    %17 = arith.maximumf %15, %16 : vector<16x256xf32>
    %18 = arith.truncf %17 : vector<16x256xf32> to vector<16x256xbf16>
    %c64 = arith.constant 64 : index
    %c0_9 = arith.constant 0 : index
    %19 = vector.load %arg2[%c64, %c0_9] : memref<912x256xbf16, #tpu.memory_space<vmem>>, vector<256x256xbf16>
    %cst_10 = arith.constant dense<0.000000e+00> : vector<16x256xf32>
    %20 = tpu.matmul %10, %19, %cst_10 {dimension_numbers = #tpu.dot_dimension_numbers<[1], [0], [0], [1], [0, 0, 1, 1], [], []>} : vector<16x256xbf16>, vector<256x256xbf16>, vector<16x256xf32> -> vector<16x256xf32>
    %21 = vector.extract_strided_slice %2 {offsets = [2, 0], sizes = [1, 256], strides = [1, 1]} : vector<16x256xf32> to vector<1x256xf32>
    %22 = vector.broadcast %21 : vector<1x256xf32> to vector<16x256xf32>
    %23 = arith.addf %20, %22 : vector<16x256xf32>
    %cst_11 = arith.constant 0.000000e+00 : f32
    %24 = vector.broadcast %cst_11 : f32 to vector<16x256xf32>
    %25 = arith.maximumf %23, %24 : vector<16x256xf32>
    %26 = arith.truncf %25 : vector<16x256xf32> to vector<16x256xbf16>
    %c320 = arith.constant 320 : index
    %c0_12 = arith.constant 0 : index
    %27 = vector.load %arg2[%c320, %c0_12] : memref<912x256xbf16, #tpu.memory_space<vmem>>, vector<256x256xbf16>
    %cst_13 = arith.constant dense<0.000000e+00> : vector<16x256xf32>
    %28 = tpu.matmul %18, %27, %cst_13 {dimension_numbers = #tpu.dot_dimension_numbers<[1], [0], [0], [1], [0, 0, 1, 1], [], []>} : vector<16x256xbf16>, vector<256x256xbf16>, vector<16x256xf32> -> vector<16x256xf32>
    %29 = vector.extract_strided_slice %2 {offsets = [3, 0], sizes = [1, 256], strides = [1, 1]} : vector<16x256xf32> to vector<1x256xf32>
    %30 = vector.broadcast %29 : vector<1x256xf32> to vector<16x256xf32>
    %31 = arith.addf %28, %30 : vector<16x256xf32>
    %cst_14 = arith.constant 0.000000e+00 : f32
    %32 = vector.broadcast %cst_14 : f32 to vector<16x256xf32>
    %33 = arith.maximumf %31, %32 : vector<16x256xf32>
    %34 = arith.truncf %33 : vector<16x256xf32> to vector<16x256xbf16>
    %c864 = arith.constant 864 : index
    %c0_15 = arith.constant 0 : index
    %35 = vector.load %arg2[%c864, %c0_15] : memref<912x256xbf16, #tpu.memory_space<vmem>>, vector<16x256xbf16>
    %cst_16 = arith.constant dense<0.000000e+00> : vector<16x16xf32>
    %36 = tpu.matmul %26, %35, %cst_16 {dimension_numbers = #tpu.dot_dimension_numbers<[1], [1], [0], [0], [0, 0, 1, 0], [], []>} : vector<16x256xbf16>, vector<16x256xbf16>, vector<16x16xf32> -> vector<16x16xf32>
    %37 = vector.extract_strided_slice %2 {offsets = [4, 0], sizes = [1, 16], strides = [1, 1]} : vector<16x256xf32> to vector<1x16xf32>
    %38 = vector.broadcast %37 : vector<1x16xf32> to vector<16x16xf32>
    %39 = arith.addf %36, %38 : vector<16x16xf32>
    %cst_17 = arith.constant 0.000000e+00 : f32
    %40 = vector.broadcast %cst_17 : f32 to vector<16x16xf32>
    %41 = arith.maximumf %39, %40 : vector<16x16xf32>
    %42 = arith.truncf %41 : vector<16x16xf32> to vector<16x16xbf16>
    %c880 = arith.constant 880 : index
    %c0_18 = arith.constant 0 : index
    %43 = vector.load %arg2[%c880, %c0_18] : memref<912x256xbf16, #tpu.memory_space<vmem>>, vector<16x256xbf16>
    %cst_19 = arith.constant dense<0.000000e+00> : vector<16x16xf32>
    %44 = tpu.matmul %34, %43, %cst_19 {dimension_numbers = #tpu.dot_dimension_numbers<[1], [1], [0], [0], [0, 0, 1, 0], [], []>} : vector<16x256xbf16>, vector<16x256xbf16>, vector<16x16xf32> -> vector<16x16xf32>
    %45 = vector.extract_strided_slice %2 {offsets = [5, 0], sizes = [1, 16], strides = [1, 1]} : vector<16x256xf32> to vector<1x16xf32>
    %46 = vector.broadcast %45 : vector<1x16xf32> to vector<16x16xf32>
    %47 = arith.addf %44, %46 : vector<16x16xf32>
    %cst_20 = arith.constant 0.000000e+00 : f32
    %48 = vector.broadcast %cst_20 : f32 to vector<16x16xf32>
    %49 = arith.maximumf %47, %48 : vector<16x16xf32>
    %50 = arith.truncf %49 : vector<16x16xf32> to vector<16x16xbf16>
    %c832 = arith.constant 832 : index
    %c0_21 = arith.constant 0 : index
    %51 = vector.load %arg2[%c832, %c0_21] : memref<912x256xbf16, #tpu.memory_space<vmem>>, vector<16x256xbf16>
    %cst_22 = arith.constant dense<0.000000e+00> : vector<16x256xf32>
    %52 = tpu.matmul %42, %51, %cst_22 {dimension_numbers = #tpu.dot_dimension_numbers<[1], [0], [0], [1], [0, 0, 1, 1], [], []>} : vector<16x16xbf16>, vector<16x256xbf16>, vector<16x256xf32> -> vector<16x256xf32>
    %c848 = arith.constant 848 : index
    %c0_23 = arith.constant 0 : index
    %53 = vector.load %arg2[%c848, %c0_23] : memref<912x256xbf16, #tpu.memory_space<vmem>>, vector<16x256xbf16>
    %cst_24 = arith.constant dense<0.000000e+00> : vector<16x256xf32>
    %54 = tpu.matmul %50, %53, %cst_24 {dimension_numbers = #tpu.dot_dimension_numbers<[1], [0], [0], [1], [0, 0, 1, 1], [], []>} : vector<16x16xbf16>, vector<16x256xbf16>, vector<16x256xf32> -> vector<16x256xf32>
    %55 = arith.addf %52, %54 : vector<16x256xf32>
    %56 = vector.extract_strided_slice %2 {offsets = [6, 0], sizes = [1, 256], strides = [1, 1]} : vector<16x256xf32> to vector<1x256xf32>
    %57 = vector.broadcast %56 : vector<1x256xf32> to vector<16x256xf32>
    %58 = arith.addf %55, %57 : vector<16x256xf32>
    %cst_25 = arith.constant 0.000000e+00 : f32
    %59 = vector.broadcast %cst_25 : f32 to vector<16x256xf32>
    %60 = arith.maximumf %58, %59 : vector<16x256xf32>
    %61 = arith.truncf %60 : vector<16x256xf32> to vector<16x256xbf16>
    %c576 = arith.constant 576 : index
    %c0_26 = arith.constant 0 : index
    %62 = vector.load %arg2[%c576, %c0_26] : memref<912x256xbf16, #tpu.memory_space<vmem>>, vector<256x256xbf16>
    %cst_27 = arith.constant dense<0.000000e+00> : vector<16x256xf32>
    %63 = tpu.matmul %61, %62, %cst_27 {dimension_numbers = #tpu.dot_dimension_numbers<[1], [0], [0], [1], [0, 0, 1, 1], [], []>} : vector<16x256xbf16>, vector<256x256xbf16>, vector<16x256xf32> -> vector<16x256xf32>
    %64 = vector.extract_strided_slice %2 {offsets = [7, 0], sizes = [1, 256], strides = [1, 1]} : vector<16x256xf32> to vector<1x256xf32>
    %65 = vector.broadcast %64 : vector<1x256xf32> to vector<16x256xf32>
    %66 = arith.addf %63, %65 : vector<16x256xf32>
    %cst_28 = arith.constant 0.000000e+00 : f32
    %67 = vector.broadcast %cst_28 : f32 to vector<16x256xf32>
    %68 = arith.maximumf %66, %67 : vector<16x256xf32>
    %69 = arith.truncf %68 : vector<16x256xf32> to vector<16x256xbf16>
    %c896 = arith.constant 896 : index
    %c0_29 = arith.constant 0 : index
    %70 = vector.load %arg2[%c896, %c0_29] : memref<912x256xbf16, #tpu.memory_space<vmem>>, vector<16x256xbf16>
    %cst_30 = arith.constant dense<0.000000e+00> : vector<16x16xf32>
    %71 = tpu.matmul %69, %70, %cst_30 {dimension_numbers = #tpu.dot_dimension_numbers<[1], [1], [0], [0], [0, 0, 1, 0], [], []>} : vector<16x256xbf16>, vector<16x256xbf16>, vector<16x16xf32> -> vector<16x16xf32>
    %72 = vector.extract_strided_slice %2 {offsets = [8, 0], sizes = [1, 16], strides = [1, 1]} : vector<16x256xf32> to vector<1x16xf32>
    %73 = vector.broadcast %72 : vector<1x16xf32> to vector<16x16xf32>
    %74 = arith.addf %71, %73 : vector<16x16xf32>
    %c0_31 = arith.constant 0 : index
    %c0_32 = arith.constant 0 : index
    %75 = vector.load %arg4[%c0_31, %c0_32] : memref<16x16xf32, #tpu.memory_space<vmem>>, vector<16x16xf32>
    tpu.vector_store %arg4[%c0_31, %c0_32], %74 {strides = array<i32>} : memref<16x16xf32, #tpu.memory_space<vmem>>, vector<16x16xf32>,
    return
  }
  func.func @transform_0(%arg0: i32) -> (i32, i32) {
    %c0_i32 = arith.constant 0 : i32
    %c0_i32_0 = arith.constant 0 : i32
    return %arg0, %c0_i32 : i32, i32
  }
  func.func @transform_1(%arg0: i32) -> (i32, i32) {
    %c0_i32 = arith.constant 0 : i32
    %c0_i32_0 = arith.constant 0 : i32
    %c0_i32_1 = arith.constant 0 : i32
    return %c0_i32, %c0_i32_0 : i32, i32
  }
  func.func @transform_2(%arg0: i32) -> (i32, i32) {
    %c0_i32 = arith.constant 0 : i32
    %c0_i32_0 = arith.constant 0 : i32
    %c0_i32_1 = arith.constant 0 : i32
    return %c0_i32, %c0_i32_0 : i32, i32
  }
  func.func @transform_3(%arg0: i32) -> (i32, i32) {
    %c0_i32 = arith.constant 0 : i32
    %c0_i32_0 = arith.constant 0 : i32
    return %arg0, %c0_i32 : i32, i32
  }
}

</mosaic_0001>

<bundles_post_ra>
// kernel: tpu_custom_call.1
= control target key start
LH: loop header
LB: loop body
LE: loop exit
PB: predicated region body
PF: predicated region fallthrough
CT: control target
= control target key end

     0   :  { %8 = vsyncpa [#allocation3], 0  ;;  %s1840_s0 = inlined_call_operand.hbm [shape: f32[16,32], index: 0, kind: input, shape index: {}]   ;;  %s1841_s1 = inlined_call_operand.hbm [shape: bf16[912,256], index: 1, kind: input, shape index: {}]   ;;  %s1842_s2 = inlined_call_operand.hbm [shape: f32[16,256], index: 2, kind: input, shape index: {}]   ;;  %s1843_s3 = inlined_call_operand.hbm [shape: f32[16,16], index: 3, kind: output, shape index: {}]  }
   0x1   :  { %9 = vsyncpa [#allocation6], 0 }
   0x2   :  { %10 = vsyncpa [#allocation4], 0  ;;  %s1704_s12 = smov [#allocation5]   ;;  %s1705_s14 = smov [#allocation2]  }
   0x3   :  { %s28_s13 = sshll.u32 %s1704_s12, 4  ;;  %s16_s15 = sshll.u32 %s1705_s14, 4  ;;  %s29_s13 = int_to_ptr.vmem [resolvable:$true] %s28_s13  ;;  %s1733_s15 = int_to_ptr.vmem [resolvable:$true] %s16_s15 }
   0x4   :  { %s1610_s18 = scalar_lea.hbm %s1841_s1, 14592 }
   0x5   :  { %p1611_p0 = scmp.ne.s32.totalorder %s1841_s1, %s1610_s18  ;;  %p1614_p1 = scmp.lt.u32.totalorder %s1610_s18, %s1841_s1 }
   0x7   :  { %p1616_p2 = pnand %p1614_p1, %p1611_p0 }
   0x9   :  { %1619 = shalt.err (!%p1616_p2)
}
   0xa   :  { %s1620_s23 = scalar_lea.vmem %s29_s13, 14592  ;;  %p1625_p4 = scmp.lt.s32.totalorder %s29_s13, %s29_s13 }
   0xb   :  { %p1621_p3 = scmp.ne.s32.totalorder %s29_s13, %s1620_s23  ;;  %p1626_p5 = scmp.lt.s32.totalorder %s1620_s23, %s1620_s23 }
   0xd   :  { %p1627_p6 = por %p1626_p5, %p1625_p4 }
   0xf   :  { %p1628_p7 = pnand %p1627_p6, %p1621_p3 }
  0x11   :  { %1631 = shalt.err (!%p1628_p7)
}
  0x12   :  { %s1706_s24 = smov 128   ;;  %s1707_s25 = smov 8  }
  0x13   :  { %34 = dma.hbm_to_vmem [thread:$0]  %s1841_s1, 14592, %s29_s13, [#allocation6], %s1706_s24, %s1706_s24, %s1707_s25  }
  0x14   :  { %s1632_s30 = scalar_lea.hbm %s1840_s0, 256 }
  0x15   :  { %p1633_p8 = scmp.ne.s32.totalorder %s1840_s0, %s1632_s30  ;;  %p1636_p9 = scmp.lt.u32.totalorder %s1632_s30, %s1840_s0 }
  0x17   :  { %p1638_p10 = pnand %p1636_p9, %p1633_p8 }
  0x19   :  { %1641 = shalt.err (!%p1638_p10)
}
  0x1a   :  { %s1642_s8 = scalar_lea.vmem %s1733_s15, 256  ;;  %p1647_p12 = scmp.lt.s32.totalorder %s1733_s15, %s1733_s15 }
  0x1b   :  { %p1643_p11 = scmp.ne.s32.totalorder %s1733_s15, %s1642_s8  ;;  %p1648_p13 = scmp.lt.s32.totalorder %s1642_s8, %s1642_s8 }
  0x1d   :  { %p1649_p0 = por %p1648_p13, %p1647_p12 }
  0x1f   :  { %p1650_p1 = pnand %p1649_p0, %p1643_p11 }
  0x21   :  { %1653 = shalt.err (!%p1650_p1)
}
  0x22   :  { %22 = dma.hbm_to_vmem [thread:$0]  %s1840_s0, 256, %s1733_s15, [#allocation3], %s1706_s24, %s1706_s24, %s1707_s25  }
  0x23   :  { %s1708_s10 = smov [#allocation7]   ;;  %s1654_s14 = scalar_lea.hbm %s1842_s2, 512 }
  0x24   :  { %s40_s11 = sshll.u32 %s1708_s10, 4  ;;  %p1655_p2 = scmp.ne.s32.totalorder %s1842_s2, %s1654_s14  ;;  %s41_s11 = int_to_ptr.vmem [resolvable:$true] %s40_s11 }
  0x25   :  { %p1658_p3 = scmp.lt.u32.totalorder %s1654_s14, %s1842_s2 }
  0x27   :  { %p1660_p4 = pnand %p1658_p3, %p1655_p2 }
  0x29   :  { %1663 = shalt.err (!%p1660_p4)
}
  0x2a   :  { %s1664_s20 = scalar_lea.vmem %s41_s11, 512  ;;  %p1669_p6 = scmp.lt.s32.totalorder %s41_s11, %s41_s11 }
  0x2b   :  { %p1665_p5 = scmp.ne.s32.totalorder %s41_s11, %s1664_s20  ;;  %p1670_p7 = scmp.lt.s32.totalorder %s1664_s20, %s1664_s20 }
  0x2d   :  { %p1671_p8 = por %p1670_p7, %p1669_p6 }
  0x2f   :  { %p1672_p9 = pnand %p1671_p8, %p1665_p5 }
  0x31   :  { %1675 = shalt.err (!%p1672_p9)
}
  0x32   :  { %s1709_s0 = smov 256   ;;  %s1710_s15 = smov 16  }
  0x33   :  { %46 = dma.hbm_to_vmem [thread:$0]  %s1842_s2, 512, %s41_s11, [#allocation6], %s1709_s0, %s1709_s0, %s1710_s15  }
  0x34   :  { %1698 = dma.done.wait [#allocation3], 256  }
  0x35   :  { %1699 = vsyncadd [#allocation3], 4294967040 }
  0x36   :  { %1700 = dma.done.wait [#allocation6], 15104  }
  0x37   :  { %1701 = vsyncadd [#allocation6], 4294952192  ;;  %v1711_v0 = vmov 0   ;;  %v1439_v1 = vld [vmem:[#allocation5 + $0x4] ss:$8 sps:$4 sm:$0xff]   ;;  %v57_v5 = vld [vmem:[#allocation2] sm:$0xff] }
  0x38   :  { %131 = vmatprep.mubr.bf16.mxu0 %v1711_v0  ;;  %v1441_v2 = vld [vmem:[#allocation5] ss:$8 sps:$4 sm:$0xff]   ;;  %99 = vmatprep.subr.bf16.mxu0 %v1439_v1  ;;  %v1442_v3 = vld [vmem:[#allocation5 + $0x14] ss:$8 sps:$4 sm:$0xff]   ;;  %v1444_v4 = vld [vmem:[#allocation5 + $0x10] ss:$8 sps:$4 sm:$0xff]  }
  0x39   :  { %100 = vmatpush1.bf16.msra.mxu0 %v1441_v2  ;;  %v58_v6 = vld [vmem:[#allocation2 + $0x8] sm:$0xff]  ;;  %v1447_v7 = vld [vmem:[#allocation5 + $0x24] ss:$8 sps:$4 sm:$0xff]   ;;  %vm95_vm0 = vcmask 261120   ;;  %v1445_v9 = vld [vmem:[#allocation5 + $0x20] ss:$8 sps:$4 sm:$0xff]  }
  0x3a   :  { %101 = vmatprep.subr.bf16.mxu0 %v1442_v3  ;;  %v59_v8 = vpack.c.bf16 %v58_v6, %v57_v5  ;;  %v1450_v10 = vld [vmem:[#allocation5 + $0x34] ss:$8 sps:$4 sm:$0xff]   ;;  %v1448_v11 = vld [vmem:[#allocation5 + $0x30] ss:$8 sps:$4 sm:$0xff]   ;;  %v1460_v12 = vld [vmem:[#allocation5 + $0x144] ss:$8 sps:$4 sm:$0xff]  }
  0x3b   :  { %v1462_v13 = vld [vmem:[#allocation5 + $0x140] ss:$8 sps:$4 sm:$0xff]   ;;  %v1453_v14 = vld [vmem:[#allocation5 + $0x44] ss:$8 sps:$4 sm:$0xff]   ;;  %678 = vmatprep.subr.bf16.mxu1 %v1460_v12  ;;  %v1466_v15 = vld [vmem:[#allocation5 + $0x154] ss:$8 sps:$4 sm:$0xff]  }
  0x3c   :  { %679 = vmatpush1.bf16.msra.mxu1 %v1462_v13  ;;  %v1468_v16 = vld [vmem:[#allocation5 + $0x150] ss:$8 sps:$4 sm:$0xff]   ;;  %v1451_v17 = vld [vmem:[#allocation5 + $0x40] ss:$8 sps:$4 sm:$0xff]   ;;  %v1456_v18 = vld [vmem:[#allocation5 + $0x54] ss:$8 sps:$4 sm:$0xff]   ;;  %v67_v13 = vlaneseq }
  0x3d   :  { %102 = vmatpush1.bf16.msra.mxu0 %v1444_v4  ;;  %680 = vmatprep.subr.bf16.mxu1 %v1466_v15  ;;  %v1472_v19 = vld [vmem:[#allocation5 + $0x164] ss:$8 sps:$4 sm:$0xff]   ;;  %v1474_v20 = vld [vmem:[#allocation5 + $0x160] ss:$8 sps:$4 sm:$0xff]   ;;  %v1478_v21 = vld [vmem:[#allocation5 + $0x174] ss:$8 sps:$4 sm:$0xff]  }
  0x3e   :  { %180 = vmatprep.subr.bf16.mxu0 %v1447_v7  ;;  %v1454_v22 = vld [vmem:[#allocation5 + $0x50] ss:$8 sps:$4 sm:$0xff]   ;;  %v1459_v23 = vld [vmem:[#allocation5 + $0x64] ss:$8 sps:$4 sm:$0xff]   ;;  %v1457_v26 = vld [vmem:[#allocation5 + $0x60] ss:$8 sps:$4 sm:$0xff]  }
  0x3f   :  { %v1480_v24 = vld [vmem:[#allocation5 + $0x170] ss:$8 sps:$4 sm:$0xff]   ;;  %v1484_v25 = vld [vmem:[#allocation5 + $0x184] ss:$8 sps:$4 sm:$0xff]   ;;  %v1465_v27 = vld [vmem:[#allocation5 + $0x74] ss:$8 sps:$4 sm:$0xff]  }
  0x40   :  { %1312 = vmatmul.mubr.msk.bf16.vlgmr.msra.gmra.mrb[0].mxu0 %vm95_vm0, %v59_v8  ;;  %681 = vmatpush1.bf16.msra.mxu1 %v1468_v16  ;;  %v1486_v28 = vld [vmem:[#allocation5 + $0x180] ss:$8 sps:$4 sm:$0xff]   ;;  %v1490_v29 = vld [vmem:[#allocation5 + $0x194] ss:$8 sps:$4 sm:$0xff]   ;;  %v1463_v30 = vld [vmem:[#allocation5 + $0x70] ss:$8 sps:$4 sm:$0xff]  }
  0x41   :  { %181 = vmatpush1.bf16.msra.mxu0 %v1445_v9  ;;  %212 = vmatprep.mubr.bf16.mxu0 %v1711_v0  ;;  %v1471_v31 = vld [vmem:[#allocation5 + $0x84] ss:$8 sps:$4 sm:$0xff]   ;;  %v1492_v32 = vld [vmem:[#allocation5 + $0x190] ss:$8 sps:$4 sm:$0xff]   ;;  %v1469_v34 = vld [vmem:[#allocation5 + $0x80] ss:$8 sps:$4 sm:$0xff]  }
  0x42   :  { %182 = vmatprep.subr.bf16.mxu0 %v1450_v10  ;;  %682 = vmatprep.subr.bf16.mxu1 %v1472_v19  ;;  %v1496_v33 = vld [vmem:[#allocation5 + $0x1a4] ss:$8 sps:$4 sm:$0xff]   ;;  %v1477_v35 = vld [vmem:[#allocation5 + $0x94] ss:$8 sps:$4 sm:$0xff]   ;;  %v1498_v36 = vld [vmem:[#allocation5 + $0x1a0] ss:$8 sps:$4 sm:$0xff]  }
  0x43   :  { %v1502_v37 = vld [vmem:[#allocation5 + $0x1b4] ss:$8 sps:$4 sm:$0xff]   ;;  %v1475_v38 = vld [vmem:[#allocation5 + $0x90] ss:$8 sps:$4 sm:$0xff]   ;;  %v1483_v39 = vld [vmem:[#allocation5 + $0xa4] ss:$8 sps:$4 sm:$0xff]  }
  0x44   :  { %683 = vmatpush1.bf16.msra.mxu1 %v1474_v20  ;;  %v1481_v40 = vld [vmem:[#allocation5 + $0xa0] ss:$8 sps:$4 sm:$0xff]   ;;  %v1504_v41 = vld [vmem:[#allocation5 + $0x1b0] ss:$8 sps:$4 sm:$0xff]   ;;  %v1508_v42 = vld [vmem:[#allocation5 + $0x1c4] ss:$8 sps:$4 sm:$0xff]  }
  0x45   :  { %183 = vmatpush1.bf16.msra.mxu0 %v1448_v11  ;;  %684 = vmatprep.subr.bf16.mxu1 %v1478_v21  ;;  %v1489_v43 = vld [vmem:[#allocation5 + $0xb4] ss:$8 sps:$4 sm:$0xff]   ;;  %v1510_v44 = vld [vmem:[#allocation5 + $0x1c0] ss:$8 sps:$4 sm:$0xff]   ;;  %v1487_v46 = vld [vmem:[#allocation5 + $0xb0] ss:$8 sps:$4 sm:$0xff]  }
  0x46   :  { %429 = vmatprep.subr.bf16.mxu0 %v1453_v14  ;;  %v1514_v45 = vld [vmem:[#allocation5 + $0x1d4] ss:$8 sps:$4 sm:$0xff]   ;;  %v1495_v47 = vld [vmem:[#allocation5 + $0xc4] ss:$8 sps:$4 sm:$0xff]   ;;  %v1516_v48 = vld [vmem:[#allocation5 + $0x1d0] ss:$8 sps:$4 sm:$0xff]  }
  0x47   :  { %v1520_v49 = vld [vmem:[#allocation5 + $0x1e4] ss:$8 sps:$4 sm:$0xff]   ;;  %v1493_v50 = vld [vmem:[#allocation5 + $0xc0] ss:$8 sps:$4 sm:$0xff]   ;;  %v1501_v51 = vld [vmem:[#allocation5 + $0xd4] ss:$8 sps:$4 sm:$0xff]  }
  0x48   :  { %1317 = vmatmul.mubr.msk.bf16.vlgmr.msra.gmra.mrb[4].mxu0 %vm95_vm0, %v59_v8  ;;  %685 = vmatpush1.bf16.msra.mxu1 %v1480_v24  ;;  %v1522_v52 = vld [vmem:[#allocation5 + $0x1e0] ss:$8 sps:$4 sm:$0xff]   ;;  %v1526_v53 = vld [vmem:[#allocation5 + $0x1f4] ss:$8 sps:$4 sm:$0xff]   ;;  %v1499_v54 = vld [vmem:[#allocation5 + $0xd0] ss:$8 sps:$4 sm:$0xff]  }
  0x49   :  { %430 = vmatpush1.bf16.msra.mxu0 %v1451_v17  ;;  %686 = vmatprep.subr.bf16.mxu1 %v1484_v25  ;;  %v1507_v55 = vld [vmem:[#allocation5 + $0xe4] ss:$8 sps:$4 sm:$0xff]   ;;  %v1505_v56 = vld [vmem:[#allocation5 + $0xe0] ss:$8 sps:$4 sm:$0xff]   ;;  %v1513_v57 = vld [vmem:[#allocation5 + $0xf4] ss:$8 sps:$4 sm:$0xff]  }
  0x4a   :  { %431 = vmatprep.subr.bf16.mxu0 %v1456_v18  ;;  %v1511_v58 = vld [vmem:[#allocation5 + $0xf0] ss:$8 sps:$4 sm:$0xff]   ;;  %v1519_v59 = vld [vmem:[#allocation5 + $0x104] ss:$8 sps:$4 sm:$0xff]   ;;  %v1517_v60 = vld [vmem:[#allocation5 + $0x100] ss:$8 sps:$4 sm:$0xff]  }
  0x4b   :  { %v1525_v61 = vld [vmem:[#allocation5 + $0x114] ss:$8 sps:$4 sm:$0xff]   ;;  %v1523_v62 = vld [vmem:[#allocation5 + $0x110] ss:$8 sps:$4 sm:$0xff]   ;;  %v1531_v1 = vld [vmem:[#allocation5 + $0x124] ss:$8 sps:$4 sm:$0xff]  }
  0x4c   :  { %687 = vmatpush1.bf16.msra.mxu1 %v1486_v28  ;;  %v1528_v63 = vld [vmem:[#allocation5 + $0x1f0] ss:$8 sps:$4 sm:$0xff]   ;;  %v1532_v2 = vld [vmem:[#allocation5 + $0x204] ss:$8 sps:$4 sm:$0xff]   ;;  %v1529_v3 = vld [vmem:[#allocation5 + $0x120] ss:$8 sps:$4 sm:$0xff]  }
  0x4d   :  { %432 = vmatpush1.bf16.msra.mxu0 %v1454_v22  ;;  %688 = vmatprep.subr.bf16.mxu1 %v1490_v29  ;;  %v1534_v4 = vld [vmem:[#allocation5 + $0x200] ss:$8 sps:$4 sm:$0xff]   ;;  %v1537_v5 = vld [vmem:[#allocation5 + $0x134] ss:$8 sps:$4 sm:$0xff]   ;;  %v1535_v7 = vld [vmem:[#allocation5 + $0x130] ss:$8 sps:$4 sm:$0xff]  }
  0x4e   :  { %433 = vmatprep.subr.bf16.mxu0 %v1459_v23  ;;  %v1538_v6 = vld [vmem:[#allocation5 + $0x214] ss:$8 sps:$4 sm:$0xff]   ;;  %v1540_v8 = vld [vmem:[#allocation5 + $0x210] ss:$8 sps:$4 sm:$0xff]   ;;  %v1541_v9 = vld [vmem:[#allocation5 + $0x224] ss:$8 sps:$4 sm:$0xff]  }
  0x4f   :  { %v1543_v10 = vld [vmem:[#allocation5 + $0x220] ss:$8 sps:$4 sm:$0xff]   ;;  %v1544_v11 = vld [vmem:[#allocation5 + $0x234] ss:$8 sps:$4 sm:$0xff]   ;;  %v1546_v12 = vld [vmem:[#allocation5 + $0x230] ss:$8 sps:$4 sm:$0xff]  }
  0x50   :  { %689 = vmatpush1.bf16.msra.mxu1 %v1492_v32  ;;  %v1786_v14 = vshrl.u32 %v67_v13, 7  ;;  %v1791_v16 = vld [vmem:[#allocation7] sm:$0xff]  ;;  %v1793_v17 = vld [vmem:[#allocation7 + $0x8] sm:$0xff]  ;;  %vm861_vm1 = vcmask 130048   ;;  %s1712_s2 = smov [#allocation8]  }
  0x51   :  { %434 = vmatpush1.bf16.msra.mxu0 %v1457_v26  ;;  %690 = vmatprep.subr.bf16.mxu1 %v1496_v33  ;;  %s1295_s23 = sshll.u32 %s1712_s2, 4  ;;  %s1296_s23 = int_to_ptr.vmem [resolvable:$true] %s1295_s23 }
  0x52   :  { %435 = vmatprep.subr.bf16.mxu0 %v1465_v27  ;;  %v1789_v15 = vsub.s32 0, %v1786_v14  ;;  %v154_v23 = vsub.s32 1, %v1786_v14  ;;  %s1676_s26 = scalar_lea.vmem %s1296_s23, 256  ;;  %p1681_p11 = scmp.lt.s32.totalorder %s1296_s23, %s1296_s23 }
  0x53   :  { %p1677_p10 = scmp.ne.s32.totalorder %s1296_s23, %s1676_s26  ;;  %p1682_p12 = scmp.lt.s32.totalorder %s1676_s26, %s1676_s26 }
  0x54   :  { %691 = vmatpush1.bf16.msra.mxu1 %v1498_v36  ;;  %v70_v18 = vrot.slane %v1791_v16, %v1789_v15  ;;  %v74_v19 = vrot.slane %v1793_v17, %v1789_v15 }
  0x55   :  { %436 = vmatpush1.bf16.msra.mxu0 %v1463_v30  ;;  %692 = vmatprep.subr.bf16.mxu1 %v1502_v37  ;;  %p1683_p13 = por %p1682_p12, %p1681_p11 }
  0x56   :  { %437 = vmatprep.subr.bf16.mxu0 %v1471_v31  ;;  %v155_v31 = vrot.slane %v1791_v16, %v154_v23 }
  0x57   :  { %p1684_p0 = pnand %p1683_p13, %p1677_p10 }
  0x58   :  { %693 = vmatpush1.bf16.msra.mxu1 %v1504_v41 }
  0x59   :  { %438 = vmatpush1.bf16.msra.mxu0 %v1469_v34  ;;  %694 = vmatprep.subr.bf16.mxu1 %v1508_v42  ;;  %v159_v34 = vrot.slane %v1793_v17, %v154_v23 }
  0x5a   :  { %439 = vmatprep.subr.bf16.mxu0 %v1477_v35 }
  0x5c   :  { %695 = vmatpush1.bf16.msra.mxu1 %v1510_v44 }
  0x5d   :  { %440 = vmatpush1.bf16.msra.mxu0 %v1475_v38  ;;  %696 = vmatprep.subr.bf16.mxu1 %v1514_v45 }
  0x5e   :  { %441 = vmatprep.subr.bf16.mxu0 %v1483_v39 }
  0x60   :  { %697 = vmatpush1.bf16.msra.mxu1 %v1516_v48 }
  0x61   :  { %442 = vmatpush1.bf16.msra.mxu0 %v1481_v40  ;;  %698 = vmatprep.subr.bf16.mxu1 %v1520_v49 }
  0x62   :  { %443 = vmatprep.subr.bf16.mxu0 %v1489_v43 }
  0x64   :  { %699 = vmatpush1.bf16.msra.mxu1 %v1522_v52  ;;  %v1547_v52 = vld [vmem:[#allocation5 + $0x360] ss:$8 sps:$4 sm:$0xff]  }
  0x65   :  { %444 = vmatpush1.bf16.msra.mxu0 %v1487_v46  ;;  %700 = vmatprep.subr.bf16.mxu1 %v1526_v53  ;;  %v1552_v53 = vld [vmem:[#allocation5 + $0x374] ss:$8 sps:$4 sm:$0xff]  }
  0x66   :  { %445 = vmatprep.subr.bf16.mxu0 %v1495_v47 }
  0x68   :  { %701 = vmatpush1.bf16.msra.mxu1 %v1528_v63 }
  0x69   :  { %446 = vmatpush1.bf16.msra.mxu0 %v1493_v50  ;;  %702 = vmatprep.subr.bf16.mxu1 %v1532_v2 }
  0x6a   :  { %447 = vmatprep.subr.bf16.mxu0 %v1501_v51  ;;  %v1549_v51 = vld [vmem:[#allocation5 + $0x364] ss:$8 sps:$4 sm:$0xff]  }
  0x6c   :  { %703 = vmatpush1.bf16.msra.mxu1 %v1534_v4 }
  0x6d   :  { %448 = vmatpush1.bf16.msra.mxu0 %v1499_v54  ;;  %704 = vmatprep.subr.bf16.mxu1 %v1538_v6  ;;  %v263_v54 = vsub.s32 2, %v1786_v14 }
  0x6e   :  { %449 = vmatprep.subr.bf16.mxu0 %v1507_v55 }
  0x6f   :  { %v264_v55 = vrot.slane %v1791_v16, %v263_v54 }
  0x70   :  { %705 = vmatpush1.bf16.msra.mxu1 %v1540_v8 }
  0x71   :  { %450 = vmatpush1.bf16.msra.mxu0 %v1505_v56  ;;  %706 = vmatprep.subr.bf16.mxu1 %v1541_v9  ;;  %v268_v56 = vrot.slane %v1793_v17, %v263_v54  ;;  %v1589_v54 = vld [vmem:[#allocation5 + $0x2e0] ss:$8 sps:$4 sm:$0xff]  }
  0x72   :  { %451 = vmatprep.subr.bf16.mxu0 %v1513_v57 }
  0x74   :  { %707 = vmatpush1.bf16.msra.mxu1 %v1543_v10 }
  0x75   :  { %452 = vmatpush1.bf16.msra.mxu0 %v1511_v58  ;;  %708 = vmatprep.subr.bf16.mxu1 %v1544_v11 }
  0x76   :  { %453 = vmatprep.subr.bf16.mxu0 %v1519_v59 }
  0x78   :  { %709 = vmatpush1.bf16.msra.mxu1 %v1546_v12  ;;  %v1550_v12 = vld [vmem:[#allocation5 + $0x370] ss:$8 sps:$4 sm:$0xff]  }
  0x79   :  { %454 = vmatpush1.bf16.msra.mxu0 %v1517_v60  ;;  %v512_v60 = vsub.s32 3, %v1786_v14 }
  0x7a   :  { %455 = vmatprep.subr.bf16.mxu0 %v1525_v61 }
  0x7b   :  { %v517_v8 = vrot.slane %v1793_v17, %v512_v60 }
  0x7d   :  { %456 = vmatpush1.bf16.msra.mxu0 %v1523_v62 }
  0x7e   :  { %457 = vmatprep.subr.bf16.mxu0 %v1531_v1 }
  0x81   :  { %458 = vmatpush1.bf16.msra.mxu0 %v1529_v3 }
  0x82   :  { %459 = vmatprep.subr.bf16.mxu0 %v1537_v5  ;;  %v513_v5 = vrot.slane %v1791_v16, %v512_v60  ;;  %v1598_v60 = vld [vmem:[#allocation5 + $0x310] ss:$8 sps:$4 sm:$0xff]  }
  0x85   :  { %460 = vmatpush1.bf16.msra.mxu0 %v1535_v7 }
  0x86   :  { %743 = vmatprep.subr.bf16.mxu0 %v1549_v51  ;;  %v1588_v51 = vld [vmem:[#allocation5 + $0x2d4] ss:$8 sps:$4 sm:$0xff]  }
 0x113   :  { %v133_v20 = vpop.f32.mrb[0].mxu0 }
 0x114   :  { %v134_v21 = vadd.f32 %v133_v20, %v70_v18  ;;  %v135_v22 = vpop.f32.mrb[1].mxu0 }
 0x115   :  { %v136_v24 = vadd.f32 %v135_v22, %v74_v19  ;;  %v137_v25 = vpop.f32.mrb[2].mxu0 }
 0x116   :  { %v138_v26 = vadd.f32 %v137_v25, %v70_v18  ;;  %v139_v27 = vpop.f32.mrb[3].mxu0  ;;  %v142_v29 = vmax.f32 %v134_v21, 0.0 }
 0x117   :  { %v140_v28 = vadd.f32 %v139_v27, %v74_v19  ;;  %v143_v32 = vmax.f32 %v136_v24, 0.0 }
 0x118   :  { %v144_v30 = vmax.f32 %v138_v26, 0.0 }
 0x119   :  { %v145_v33 = vmax.f32 %v140_v28, 0.0 }
 0x11a   :  { %v146_v35 = vpack.c.bf16 %v144_v30, %v142_v29  ;;  %v1553_v30 = vld [vmem:[#allocation5 + $0x350] ss:$8 sps:$4 sm:$0xff]  }
 0x11b   :  { %v147_v36 = vpack.c.bf16 %v145_v33, %v143_v32  ;;  %v214_v37 = vpop.f32.mrb[4].mxu0  ;;  %v1558_v32 = vld [vmem:[#allocation5 + $0x344] ss:$8 sps:$4 sm:$0xff]   ;;  %v1559_v33 = vld [vmem:[#allocation5 + $0x240] ss:$8 sps:$4 sm:$0xff]  }
 0x11c   :  { %v215_v38 = vadd.f32 %v214_v37, %v155_v31  ;;  %v216_v39 = vpop.f32.mrb[5].mxu0  ;;  %v1567_v37 = vld [vmem:[#allocation5 + $0x264] ss:$8 sps:$4 sm:$0xff]  }
 0x11d   :  { %v217_v40 = vadd.f32 %v216_v39, %v159_v34  ;;  %v218_v41 = vpop.f32.mrb[6].mxu0  ;;  %461 = vmatprep.mubr.bf16.mxu0 %v147_v36  ;;  %v1562_v36 = vld [vmem:[#allocation5 + $0x250] ss:$8 sps:$4 sm:$0xff]   ;;  %v1570_v39 = vld [vmem:[#allocation5 + $0x274] ss:$8 sps:$4 sm:$0xff]  }
 0x11e   :  { %v219_v42 = vadd.f32 %v218_v41, %v155_v31  ;;  %v220_v43 = vpop.f32.mrb[7].mxu0  ;;  %462 = vmatmul.mubr.bf16.vlgmr.msra.gmra.mrb[8].mxu0 %v146_v35  ;;  %v223_v45 = vmax.f32 %v215_v38, 0.0  ;;  %v1555_v31 = vld [vmem:[#allocation5 + $0x354] ss:$8 sps:$4 sm:$0xff]   ;;  %v1565_v38 = vld [vmem:[#allocation5 + $0x260] ss:$8 sps:$4 sm:$0xff]  }
 0x11f   :  { %v221_v44 = vadd.f32 %v220_v43, %v159_v34  ;;  %v224_v47 = vmax.f32 %v217_v40, 0.0  ;;  %744 = vmatpush1.bf16.xpose.msra.mxu0 %v1547_v52  ;;  %v1561_v34 = vld [vmem:[#allocation5 + $0x244] ss:$8 sps:$4 sm:$0xff]   ;;  %v1564_v35 = vld [vmem:[#allocation5 + $0x254] ss:$8 sps:$4 sm:$0xff]  }
 0x120   :  { %v225_v46 = vmax.f32 %v219_v42, 0.0  ;;  %803 = vmatprep.subr.bf16.mxu0 %v1552_v53  ;;  %1182 = vmatprep.subr.bf16.mxu1 %v1561_v34  ;;  %v1568_v40 = vld [vmem:[#allocation5 + $0x270] ss:$8 sps:$4 sm:$0xff]   ;;  %v1573_v41 = vld [vmem:[#allocation5 + $0x284] ss:$8 sps:$4 sm:$0xff]  }
 0x121   :  { %v226_v48 = vmax.f32 %v221_v44, 0.0  ;;  %v1571_v42 = vld [vmem:[#allocation5 + $0x280] ss:$8 sps:$4 sm:$0xff]   ;;  %v1576_v43 = vld [vmem:[#allocation5 + $0x294] ss:$8 sps:$4 sm:$0xff]  }
 0x122   :  { %v227_v49 = vpack.c.bf16 %v225_v46, %v223_v45  ;;  %v1574_v44 = vld [vmem:[#allocation5 + $0x290] ss:$8 sps:$4 sm:$0xff]   ;;  %v1579_v45 = vld [vmem:[#allocation5 + $0x2a4] ss:$8 sps:$4 sm:$0xff]   ;;  %v1577_v46 = vld [vmem:[#allocation5 + $0x2a0] ss:$8 sps:$4 sm:$0xff]  }
 0x123   :  { %v228_v50 = vpack.c.bf16 %v226_v48, %v224_v47  ;;  %v1582_v47 = vld [vmem:[#allocation5 + $0x2b4] ss:$8 sps:$4 sm:$0xff]   ;;  %v1580_v48 = vld [vmem:[#allocation5 + $0x2b0] ss:$8 sps:$4 sm:$0xff]   ;;  %v1591_v53 = vld [vmem:[#allocation5 + $0x2e4] ss:$8 sps:$4 sm:$0xff]  }
 0x124   :  { %v1586_v52 = vld [vmem:[#allocation5 + $0x2d0] ss:$8 sps:$4 sm:$0xff]  }
 0x125   :  { %710 = vmatprep.mubr.bf16.mxu1 %v228_v50  ;;  %v1583_v50 = vld [vmem:[#allocation5 + $0x2c0] ss:$8 sps:$4 sm:$0xff]  }
 0x126   :  { %711 = vmatmul.mubr.bf16.vlgmr.msra.gmra.mrb[0].mxu1 %v227_v49  ;;  %v1585_v49 = vld [vmem:[#allocation5 + $0x2c4] ss:$8 sps:$4 sm:$0xff]  }
 0x127   :  { %1183 = vmatpush1.bf16.msra.mxu1 %v1559_v33 }
 0x128   :  { %1184 = vmatprep.subr.bf16.mxu1 %v1564_v35 }
 0x12b   :  { %1185 = vmatpush1.bf16.msra.mxu1 %v1562_v36 }
 0x12c   :  { %1186 = vmatprep.subr.bf16.mxu1 %v1567_v37 }
 0x12f   :  { %1187 = vmatpush1.bf16.msra.mxu1 %v1565_v38 }
 0x130   :  { %1188 = vmatprep.subr.bf16.mxu1 %v1570_v39 }
 0x133   :  { %1189 = vmatpush1.bf16.msra.mxu1 %v1568_v40 }
 0x134   :  { %1190 = vmatprep.subr.bf16.mxu1 %v1573_v41 }
 0x137   :  { %1191 = vmatpush1.bf16.msra.mxu1 %v1571_v42 }
 0x138   :  { %1192 = vmatprep.subr.bf16.mxu1 %v1576_v43 }
 0x13b   :  { %1193 = vmatpush1.bf16.msra.mxu1 %v1574_v44 }
 0x13c   :  { %1194 = vmatprep.subr.bf16.mxu1 %v1579_v45  ;;  %v1609_v45 = vld [vmem:[#allocation5 + $0x384] ss:$8 sps:$4 sm:$0xff]  }
 0x13f   :  { %1195 = vmatpush1.bf16.msra.mxu1 %v1577_v46  ;;  %v1607_v46 = vld [vmem:[#allocation5 + $0x380] ss:$8 sps:$4 sm:$0xff]  }
 0x140   :  { %1196 = vmatprep.subr.bf16.mxu1 %v1582_v47  ;;  %v1016_v47 = vsub.s32 7, %v1786_v14 }
 0x143   :  { %1197 = vmatpush1.bf16.msra.mxu1 %v1580_v48  ;;  %v1017_v48 = vrot.slane %v1791_v16, %v1016_v47 }
 0x144   :  { %1198 = vmatprep.subr.bf16.mxu1 %v1585_v49  ;;  %v1021_v49 = vrot.slane %v1793_v17, %v1016_v47 }
 0x147   :  { %1199 = vmatpush1.bf16.msra.mxu1 %v1583_v50 }
 0x148   :  { %1200 = vmatprep.subr.bf16.mxu1 %v1588_v51 }
 0x14b   :  { %1201 = vmatpush1.bf16.msra.mxu1 %v1586_v52 }
 0x14c   :  { %1202 = vmatprep.subr.bf16.mxu1 %v1591_v53 }
 0x14f   :  { %1203 = vmatpush1.bf16.msra.mxu1 %v1589_v54 }
 0x1f1   :  { %v463_v57 = vpop.f32.mrb[8].mxu0 }
 0x1f2   :  { %v464_v58 = vadd.f32 %v463_v57, %v264_v55  ;;  %v465_v59 = vpop.f32.mrb[9].mxu0  ;;  %v1597_v57 = vld [vmem:[#allocation5 + $0x304] ss:$8 sps:$4 sm:$0xff]  }
 0x1f3   :  { %v466_v61 = vadd.f32 %v465_v59, %v268_v56  ;;  %v467_v62 = vpop.f32.mrb[10].mxu0  ;;  %v1600_v59 = vld [vmem:[#allocation5 + $0x314] ss:$8 sps:$4 sm:$0xff]  }
 0x1f4   :  { %v468_v63 = vadd.f32 %v467_v62, %v264_v55  ;;  %v469_v1 = vpop.f32.mrb[11].mxu0  ;;  %v472_v3 = vmax.f32 %v464_v58, 0.0  ;;  %v1594_v55 = vld [vmem:[#allocation5 + $0x2f4] ss:$8 sps:$4 sm:$0xff]   ;;  %v1595_v58 = vld [vmem:[#allocation5 + $0x300] ss:$8 sps:$4 sm:$0xff]  }
 0x1f5   :  { %v470_v2 = vadd.f32 %v469_v1, %v268_v56  ;;  %v473_v6 = vmax.f32 %v466_v61, 0.0  ;;  %v1592_v56 = vld [vmem:[#allocation5 + $0x2f0] ss:$8 sps:$4 sm:$0xff]   ;;  %1204 = vmatprep.subr.bf16.mxu1 %v1594_v55  ;;  %v731_v61 = vsub.s32 4, %v1786_v14 }
 0x1f6   :  { %v474_v4 = vmax.f32 %v468_v63, 0.0  ;;  %1205 = vmatpush1.bf16.msra.mxu1 %v1592_v56 }
 0x1f7   :  { %v475_v7 = vmax.f32 %v470_v2, 0.0  ;;  %1206 = vmatprep.subr.bf16.mxu1 %v1597_v57  ;;  %v732_v62 = vrot.slane %v1791_v16, %v731_v61 }
 0x1f8   :  { %v476_v9 = vpack.c.bf16 %v474_v4, %v472_v3  ;;  %v791_v3 = vsub.s32 5, %v1786_v14 }
 0x1f9   :  { %v477_v10 = vpack.c.bf16 %v475_v7, %v473_v6  ;;  %v712_v11 = vpop.f32.mrb[0].mxu1 }
 0x1fa   :  { %v713_v13 = vadd.f32 %v712_v11, %v513_v5  ;;  %v714_v18 = vpop.f32.mrb[1].mxu1  ;;  %1207 = vmatpush1.bf16.msra.mxu1 %v1595_v58 }
 0x1fb   :  { %v715_v19 = vadd.f32 %v714_v18, %v517_v8  ;;  %v716_v20 = vpop.f32.mrb[2].mxu1  ;;  %775 = vmatprep.mubr.bf16.mxu0 %v477_v10  ;;  %1208 = vmatprep.subr.bf16.mxu1 %v1600_v59 }
 0x1fc   :  { %v717_v21 = vadd.f32 %v716_v20, %v513_v5  ;;  %v718_v22 = vpop.f32.mrb[3].mxu1  ;;  %776 = vmatmul.mubr.bf16.vlgmr.msra.gmra.mrb[12].mxu0 %v476_v9  ;;  %v721_v24 = vmax.f32 %v713_v13, 0.0  ;;  %v792_v9 = vrot.slane %v1791_v16, %v791_v3 }
 0x1fd   :  { %v719_v23 = vadd.f32 %v718_v22, %v517_v8  ;;  %804 = vmatpush1.bf16.xpose.msra.mxu0 %v1550_v12  ;;  %v722_v26 = vmax.f32 %v715_v19, 0.0 }
 0x1fe   :  { %v723_v25 = vmax.f32 %v717_v21, 0.0  ;;  %865 = vmatprep.subr.bf16.mxu0 %v1555_v31  ;;  %1209 = vmatpush1.bf16.msra.mxu1 %v1598_v60 }
 0x1ff   :  { %v724_v27 = vmax.f32 %v719_v23, 0.0  ;;  %v1556_v23 = vld [vmem:[#allocation5 + $0x340] ss:$8 sps:$4 sm:$0xff]  }
 0x200   :  { %v725_v28 = vpack.c.bf16 %v723_v25, %v721_v24  ;;  %v1603_v25 = vld [vmem:[#allocation5 + $0x324] ss:$8 sps:$4 sm:$0xff]  }
 0x201   :  { %v726_v29 = vpack.c.bf16 %v724_v27, %v722_v26  ;;  %v1601_v26 = vld [vmem:[#allocation5 + $0x320] ss:$8 sps:$4 sm:$0xff]   ;;  %1210 = vmatprep.subr.bf16.mxu1 %v1603_v25  ;;  %v1606_v27 = vld [vmem:[#allocation5 + $0x334] ss:$8 sps:$4 sm:$0xff]  }
 0x202   :  { %1211 = vmatpush1.bf16.msra.mxu1 %v1601_v26 }
 0x203   :  { %835 = vmatprep.mubr.bf16.mxu0 %v726_v29  ;;  %1212 = vmatprep.subr.bf16.mxu1 %v1606_v27  ;;  %v966_v29 = vsub.s32 6, %v1786_v14  ;;  %v62_v14 = vld [vmem:[#allocation7 + $0x10] sm:$0xff] }
 0x204   :  { %836 = vmatmul.mubr.bf16.vlgmr.msra.gmra.mrb[16].mxu0 %v725_v28  ;;  %v1604_v28 = vld [vmem:[#allocation5 + $0x330] ss:$8 sps:$4 sm:$0xff]  }
 0x205   :  { %897 = vmatprep.mubr.bf16.mxu0 %v1711_v0  ;;  %866 = vmatpush1.bf16.msra.mxu0 %v1553_v30  ;;  %v967_v30 = vrot.slane %v1791_v16, %v966_v29  ;;  %v971_v31 = vrot.slane %v1793_v17, %v966_v29  ;;  %v1236_v16 = vrot.slane %v62_v14, %v1789_v15 }
 0x206   :  { %921 = vmatprep.subr.bf16.mxu0 %v1558_v32  ;;  %1213 = vmatpush1.bf16.msra.mxu1 %v1604_v28 }
 0x2cf   :  { %v777_v63 = vpop.f32.mrb[12].mxu0 }
 0x2d0   :  { %v778_v1 = vadd.f32 %v777_v63, %v732_v62  ;;  %v779_v2 = vpop.f32.mrb[13].mxu0 }
 0x2d1   :  { %v780_v4 = vpop.f32.mrb[14].mxu0 }
 0x2d2   :  { %v781_v5 = vadd.f32 %v780_v4, %v732_v62  ;;  %v782_v6 = vpop.f32.mrb[15].mxu0  ;;  %v784_v7 = vmax.f32 %v778_v1, 0.0 }
 0x2d4   :  { %v785_v8 = vmax.f32 %v781_v5, 0.0 }
 0x2d6   :  { %v786_v10 = vpack.c.bf16 %v785_v8, %v784_v7 }
 0x2d7   :  { %v837_v11 = vpop.f32.mrb[16].mxu0 }
 0x2d8   :  { %v838_v12 = vadd.f32 %v837_v11, %v792_v9  ;;  %v839_v13 = vpop.f32.mrb[17].mxu0 }
 0x2d9   :  { %v840_v18 = vpop.f32.mrb[18].mxu0 }
 0x2da   :  { %v841_v19 = vadd.f32 %v840_v18, %v792_v9  ;;  %v842_v20 = vpop.f32.mrb[19].mxu0  ;;  %v844_v21 = vmax.f32 %v838_v12, 0.0 }
 0x2dc   :  { %v845_v22 = vmax.f32 %v841_v19, 0.0 }
 0x2de   :  { %v846_v24 = vpack.c.bf16 %v845_v22, %v844_v21 }
 0x2e0   :  { %1388 = vmatmul.mubr.msk.bf16.vlgmr.msra.gmra.mrb[20].mxu0 %vm861_vm1, %v846_v24 }
 0x2e1   :  { %922 = vmatpush1.bf16.msra.mxu0 %v1556_v23  ;;  %953 = vmatprep.mubr.bf16.mxu0 %v1711_v0 }
 0x2e2   :  { %1247 = vmatprep.subr.bf16.mxu0 %v1609_v45 }
 0x2ec   :  { %1391 = vmatmul.mubr.msk.bf16.vlgmr.msra.gmra.mrb[20].mxu0 %vm861_vm1, %v786_v10 }
 0x2ed   :  { %1248 = vmatpush1.bf16.xpose.msra.mxu0 %v1607_v46 }
 0x3bf   :  { %v955_v32 = vpop.f32.mrb[20].mxu0 }
 0x3c0   :  { %v972_v33 = vadd.f32 %v967_v30, %v955_v32  ;;  %v957_v34 = vpop.f32.mrb[21].mxu0 }
 0x3c1   :  { %v973_v0 = vadd.f32 %v971_v31, %v957_v34  ;;  %v959_v35 = vpop.f32.mrb[22].mxu0 }
 0x3c2   :  { %v974_v36 = vadd.f32 %v967_v30, %v959_v35  ;;  %v961_v37 = vpop.f32.mrb[23].mxu0  ;;  %v976_v39 = vmax.f32 %v972_v33, 0.0 }
 0x3c3   :  { %v975_v38 = vadd.f32 %v971_v31, %v961_v37  ;;  %v977_v41 = vmax.f32 %v973_v0, 0.0 }
 0x3c4   :  { %v978_v40 = vmax.f32 %v974_v36, 0.0 }
 0x3c5   :  { %v979_v42 = vmax.f32 %v975_v38, 0.0 }
 0x3c6   :  { %v980_v43 = vpack.c.bf16 %v978_v40, %v976_v39 }
 0x3c7   :  { %v981_v44 = vpack.c.bf16 %v979_v42, %v977_v41 }
 0x3c9   :  { %1214 = vmatprep.mubr.bf16.mxu1 %v981_v44 }
 0x3ca   :  { %1215 = vmatmul.mubr.bf16.vlgmr.msra.gmra.mrb[4].mxu1 %v980_v43 }
 0x49d   :  { %v1216_v50 = vpop.f32.mrb[4].mxu1 }
 0x49e   :  { %v1217_v51 = vadd.f32 %v1216_v50, %v1017_v48  ;;  %v1218_v52 = vpop.f32.mrb[5].mxu1 }
 0x49f   :  { %v1219_v53 = vadd.f32 %v1218_v52, %v1021_v49  ;;  %v1220_v54 = vpop.f32.mrb[6].mxu1 }
 0x4a0   :  { %v1221_v55 = vadd.f32 %v1220_v54, %v1017_v48  ;;  %v1222_v56 = vpop.f32.mrb[7].mxu1  ;;  %v1225_v58 = vmax.f32 %v1217_v51, 0.0 }
 0x4a1   :  { %v1223_v57 = vadd.f32 %v1222_v56, %v1021_v49  ;;  %v1226_v60 = vmax.f32 %v1219_v53, 0.0 }
 0x4a2   :  { %v1227_v59 = vmax.f32 %v1221_v55, 0.0 }
 0x4a3   :  { %v1228_v61 = vmax.f32 %v1223_v57, 0.0 }
 0x4a4   :  { %v1229_v62 = vpack.c.bf16 %v1227_v59, %v1225_v58 }
 0x4a5   :  { %v1230_v63 = vpack.c.bf16 %v1228_v61, %v1226_v60 }
 0x4a7   :  { %1279 = vmatprep.mubr.bf16.mxu0 %v1230_v63 }
 0x4a8   :  { %1280 = vmatmul.mubr.bf16.vlgmr.msra.gmra.mrb[24].mxu0 %v1229_v62 }
 0x57b   :  { %v1281_v17 = vpop.f32.mrb[24].mxu0 }
 0x57c   :  { %v1282_v1 = vadd.f32 %v1281_v17, %v1236_v16  ;;  %v1283_v2 = vpop.f32.mrb[25].mxu0 }
 0x57d   :  { %v1284_v3 = vpop.f32.mrb[26].mxu0 }
 0x57e   :  { %1288 = vst.msk [vmem:[#allocation8] sm:$0xff] %vm861_vm1, %v1282_v1  ;;  %v1285_v4 = vadd.f32 %v1284_v3, %v1236_v16  ;;  %v1286_v5 = vpop.f32.mrb[27].mxu0 }
 0x580   :  { %1289 = vst.msk [vmem:[#allocation8 + $0x8] sm:$0xff] %vm861_vm1, %v1285_v4 }
 0x581   :  { %1687 = shalt.err (!%p1684_p0)
}
 0x582   :  { %s1688_s29 = scalar_lea.hbm %s1843_s3, 256 }
 0x583   :  { %p1689_p1 = scmp.ne.s32.totalorder %s1843_s3, %s1688_s29  ;;  %p1692_p2 = scmp.lt.u32.totalorder %s1688_s29, %s1843_s3 }
 0x585   :  { %p1694_p3 = pnand %p1692_p2, %p1689_p1 }
 0x587   :  { %1697 = shalt.err (!%p1694_p3)
}
 0x588   :  { %1301 = dma.vmem_to_hbm [thread:$0]  %s1296_s23, 256, %s1843_s3, [#allocation4], %s1706_s24, %s1706_s24, %s1707_s25  }
 0x589   :  { %1702 = dma.done.wait [#allocation4], 256  }
 0x58a   :  { %1703 = vsyncadd [#allocation4], 4294967040 }
 0x58b   :  { %1305 = vsyncpa [#allocation3], 1 }
 0x58c   :  { %1306 = vsyncpa [#allocation6], 1 }
 0x58d   :  { %1307 = vsyncpa [#allocation4], 1 }

</bundles_post_ra>
